<compile_context>
chip_gen: v6e
topology: v6e:2x2x1
jax: 0.10.0
libtpu: 0.0.40
codegen_flags: <defaults>
</compile_context>

<pallas_src>
import functools

import jax
import jax.numpy as jnp
from jax.experimental import pallas as pl
from jax.experimental.pallas import tpu as pltpu


# ----------------------------------------------------------------------------
# Device-dependent tiling constants
# ----------------------------------------------------------------------------
def _device_kind():
    try:
        return jax.devices()[0].device_kind.lower()
    except Exception:  # pragma: no cover - defensive
        return ""


_KIND = _device_kind()
_IS_V7 = "v7" in _KIND
_OLD_GEN = any(t in _KIND for t in ("v2", "v3", "v4", "v5"))
_ROW_TILE = 128 if _OLD_GEN else 256        # 256 feeds the 256x256 MXU (v6e/v7x)
_SPLIT_ROWS = _IS_V7                        # v7x has 2 TensorCores per chip

if _IS_V7:
    _VMEM_LIMIT = 48 * 1024 * 1024          # 64 MiB physical on v7x
elif ("v5" in _KIND) or ("v6" in _KIND):
    _VMEM_LIMIT = 96 * 1024 * 1024          # 128 MiB physical on v5e/v6e
elif ("v2" in _KIND) or ("v3" in _KIND):
    _VMEM_LIMIT = None                      # tiny VMEM; keep compiler default
else:
    _VMEM_LIMIT = 32 * 1024 * 1024          # conservative fallback

_CE_TV_CAP = 1024 if _IS_V7 else 2048       # CE vocab tile cap per generation


def _cdiv(a, b):
    return -(-a // b)


def _round_up(a, b):
    return _cdiv(a, b) * b


def _row_tile(m):
    """Row (sublane) tile: <= _ROW_TILE, never padded past M, >=2 tiles on v7x."""
    tm = min(_ROW_TILE, m)
    if _SPLIT_ROWS and m >= 16:
        tm = min(tm, _round_up(_cdiv(m, 2), 8))
    if tm != m and tm % 8 != 0:
        tm = m  # single full-height tile is always a legal block shape
    return tm


def _col_tile(n, cap):
    """Largest lane-aligned (multiple-of-128) tile <= cap dividing n, or full n."""
    if n <= cap:
        return n
    if n % 128 == 0:
        best, t = 128, 128
        while t <= cap:
            if n % t == 0:
                best = t
            t += 128
        return best
    # Caller should pad to a multiple of 128; fall back to the full width.
    return n


def _compiler_params(dimension_semantics):
    kwargs = dict(dimension_semantics=dimension_semantics)
    if _VMEM_LIMIT is not None:
        kwargs["vmem_limit_bytes"] = _VMEM_LIMIT
    return pltpu.CompilerParams(**kwargs)


def _to_bf16(x):
    return x if x.dtype == jnp.bfloat16 else x.astype(jnp.bfloat16)


# ----------------------------------------------------------------------------
# Pallas kernels
# ----------------------------------------------------------------------------
def _linear_kernel(x_ref, w_ref, b_ref, o_ref, acc_ref, *, apply_gelu):
    # grid = (outer, inner, K tiles); K axis is an "arbitrary" reduction.
    k = pl.program_id(2)

    @pl.when(k == 0)
    def _():
        acc_ref[...] = jnp.zeros_like(acc_ref)

    acc_ref[...] += jnp.dot(
        x_ref[...], w_ref[...], preferred_element_type=jnp.float32
    )

    @pl.when(k == pl.num_programs(2) - 1)
    def _():
        h = acc_ref[...] + b_ref[...]
        if apply_gelu:
            h = jax.nn.gelu(h, approximate=True)
        o_ref[...] = h.astype(o_ref.dtype)


def _classify_softmax_kernel(x_ref, w_ref, b_ref, o_ref):
    # Fused: logits = x @ W + b ; softmax over vocab (lane) axis, all f32.
    logits = (
        jnp.dot(x_ref[...], w_ref[...], preferred_element_type=jnp.float32)
        + b_ref[...]
    )
    m = jnp.max(logits, axis=-1, keepdims=True)
    e = jnp.exp(logits - m)
    s = jnp.sum(e, axis=-1, keepdims=True)
    # EUP approximate reciprocal on the (tm,1) column + one Newton step
    # (near-f32 accuracy) instead of a full-width VPU divide over (tm, V).
    r = pl.reciprocal(s, approx=True)
    r = r * (2.0 - s * r)
    o_ref[...] = e * r


def _classify_ce_kernel(x_ref, w_ref, b_ref, y_ref, o_ref, m_sc, l_sc, t_sc,
                        *, tm, n_rows):
    # grid = (M tiles, V tiles); V axis is an online log-sum-exp reduction.
    i = pl.program_id(0)
    j = pl.program_id(1)

    @pl.when(j == 0)
    def _():
        m_sc[...] = jnp.full(m_sc.shape, -jnp.inf, m_sc.dtype)
        l_sc[...] = jnp.zeros(l_sc.shape, l_sc.dtype)
        t_sc[...] = jnp.zeros(t_sc.shape, t_sc.dtype)

    logits = (
        jnp.dot(x_ref[...], w_ref[...], preferred_element_type=jnp.float32)
        + b_ref[...]
    )  # (tm, tv) f32
    tv = logits.shape[1]
    vocab_ids = jax.lax.broadcasted_iota(jnp.int32, logits.shape, 1) + j * tv

    # Target logit: masked select (no f32 one-hot materialization).
    # TODO(synk): debug_check for out-of-range target ids (y >= vocab).
    t_sc[...] += jnp.sum(
        jnp.where(vocab_ids == y_ref[...], logits, 0.0), axis=-1, keepdims=True
    )

    # Online log-sum-exp accumulation across vocab tiles.
    m_new = jnp.maximum(m_sc[...], jnp.max(logits, axis=-1, keepdims=True))
    l_sc[...] = l_sc[...] * jnp.exp(m_sc[...] - m_new) + jnp.sum(
        jnp.exp(logits - m_new), axis=-1, keepdims=True
    )
    m_sc[...] = m_new

    @pl.when(j == pl.num_programs(1) - 1)
    def _():
        lse = m_sc[...] + jnp.log(l_sc[...])
        per_tok = lse - t_sc[...]  # (tm, 1)
        # Mask ragged rows of the last tile, then emit a per-tile partial sum
        # broadcast over a tiny lane-dense (8,128) block (unmasked vst).
        row_ids = jax.lax.broadcasted_iota(jnp.int32, per_tok.shape, 0) + i * tm
        masked = jnp.where(row_ids < n_rows, per_tok, 0.0)
        tile_sum = jnp.sum(masked, axis=0, keepdims=True)  # (1, 1)
        o_ref[...] = jnp.broadcast_to(tile_sum, o_ref.shape)


# ----------------------------------------------------------------------------
# Pallas wrappers
# ----------------------------------------------------------------------------
def pallas_linear(x, w, b, *, gelu=False, out_dtype=jnp.float32,
                  n_cap=512, k_cap=2048):
    """x: (M, K), w: (K, N), b: (N,) -> (M, N) out_dtype.

    Operands are bf16 on the MXU, accumulation stays f32 (VMEM scratch across
    the K grid axis).  Grid order is weight-stationary when W is the larger
    operand so each W tile is fetched from HBM only once.
    """
    M, K = x.shape
    N = w.shape[1]
    tm = _row_tile(M)
    gm = _cdiv(M, tm)
    tn = _col_tile(N, n_cap)
    gn = _cdiv(N, tn)
    tk = _col_tile(K, k_cap)
    gk = _cdiv(K, tk)

    xb = _to_bf16(x)
    wb = _to_bf16(w)
    bb = b.reshape(1, N).astype(jnp.float32)

    kernel = functools.partial(_linear_kernel, apply_gelu=gelu)

    weight_major = (K * N) > (M * K)  # weight bigger than activations
    if weight_major:
        grid = (gn, gm, gk)
        x_map = lambda j, i, k: (i, k)
        w_map = lambda j, i, k: (k, j)
        b_map = lambda j, i, k: (0, j)
        o_map = lambda j, i, k: (i, j)
    else:
        grid = (gm, gn, gk)
        x_map = lambda i, j, k: (i, k)
        w_map = lambda i, j, k: (k, j)
        b_map = lambda i, j, k: (0, j)
        o_map = lambda i, j, k: (i, j)

    return pl.pallas_call(
        kernel,
        out_shape=jax.ShapeDtypeStruct((M, N), out_dtype),
        grid=grid,
        in_specs=[
            pl.BlockSpec((tm, tk), x_map),
            pl.BlockSpec((tk, tn), w_map),
            pl.BlockSpec((1, tn), b_map),
        ],
        out_specs=pl.BlockSpec((tm, tn), o_map),
        scratch_shapes=[pltpu.VMEM((tm, tn), jnp.float32)],
        compiler_params=_compiler_params(("parallel", "parallel", "arbitrary")),
    )(xb, wb, bb)


def pallas_classify_softmax(x, w, b):
    """Fused classify head + softmax. x: (M, H), w: (H, V), b: (V,) -> (M, V) f32."""
    M, K = x.shape
    V = w.shape[1]
    tm = _row_tile(M)
    gm = _cdiv(M, tm)
    # TODO(synk): for production vocab sizes, tile V with a two-pass / online
    # softmax (or pl.Buffered(1) on the constant-index weight block) so the
    # full (H, V) weight never has to be VMEM-resident (v7x: 64 MiB).
    return pl.pallas_call(
        _classify_softmax_kernel,
        out_shape=jax.ShapeDtypeStruct((M, V), jnp.float32),
        grid=(gm,),
        in_specs=[
            pl.BlockSpec((tm, K), lambda i: (i, 0)),
            pl.BlockSpec((K, V), lambda i: (0, 0)),
            pl.BlockSpec((1, V), lambda i: (0, 0)),
        ],
        out_specs=pl.BlockSpec((tm, V), lambda i: (i, 0)),
        compiler_params=_compiler_params(("parallel",)),
    )(_to_bf16(x), _to_bf16(w), b.reshape(1, V).astype(jnp.float32))


def pallas_classify_cross_entropy(x, w, b, y):
    """Fused classify head + CE with a V-tiled online log-sum-exp.

    Returns the MEAN cross-entropy over the M tokens (torch default reduction).
    Per-row-tile partial sums are emitted from the kernel (tiny lane-dense
    writeback); the final mean is done in JAX.
    """
    M, K = x.shape
    V = w.shape[1]
    assert V % 128 == 0, "pad the classifier vocab to a multiple of 128"
    tm = _row_tile(M)
    gm = _cdiv(M, tm)
    tv = _col_tile(V, _CE_TV_CAP)
    gv = _cdiv(V, tv)

    y2 = y.reshape(M, 1).astype(jnp.int32)
    kernel = functools.partial(_classify_ce_kernel, tm=tm, n_rows=M)

    out = pl.pallas_call(
        kernel,
        out_shape=jax.ShapeDtypeStruct((gm, 8, 128), jnp.float32),
        grid=(gm, gv),
        in_specs=[
            pl.BlockSpec((tm, K), lambda i, j: (i, 0)),
            pl.BlockSpec((K, tv), lambda i, j: (0, j)),
            pl.BlockSpec((1, tv), lambda i, j: (0, j)),
            pl.BlockSpec((tm, 1), lambda i, j: (i, 0)),
        ],
        out_specs=pl.BlockSpec((1, 8, 128), lambda i, j: (i, 0, 0)),
        scratch_shapes=[
            pltpu.VMEM((tm, 1), jnp.float32),  # running max
            pltpu.VMEM((tm, 1), jnp.float32),  # running sum-exp
            pltpu.VMEM((tm, 1), jnp.float32),  # target logit
        ],
        compiler_params=_compiler_params(("parallel", "arbitrary")),
    )(_to_bf16(x), _to_bf16(w), b.reshape(1, V).astype(jnp.float32), y2)
    return jnp.sum(out[:, 0, 0]) / jnp.float32(M)


# ----------------------------------------------------------------------------
# Mini BERT encoder (deterministic synthetic weights; hot matmuls use Pallas)
# ----------------------------------------------------------------------------
def layer_norm(x, g, b, eps=1e-12):
    mu = jnp.mean(x, axis=-1, keepdims=True)
    var = jnp.mean(jnp.square(x - mu), axis=-1, keepdims=True)
    return (x - mu) * jax.lax.rsqrt(var + eps) * g + b


def transformer_layer(h, p, num_heads):
    B, S, H = h.shape
    dh = H // num_heads
    x2 = h.reshape(B * S, H)

    # Fused QKV projection (pre-fused (H,3H) weight stored in params); bf16 out.
    qkv = pallas_linear(x2, p["wqkv"], p["bqkv"], out_dtype=jnp.bfloat16)
    q, k, v = jnp.split(qkv, 3, axis=1)

    def heads(t):
        return t.reshape(B, S, num_heads, dh).transpose(0, 2, 1, 3)

    q, k, v = heads(q), heads(k), heads(v)

    # Attention score/softmax glue (tiny: S=8) stays in plain JAX.
    # TODO(synk): swap for a fused Pallas flash-attention block at production S.
    scores = jnp.einsum("bhqd,bhkd->bhqk", q, k,
                        preferred_element_type=jnp.float32)
    scores = scores * (1.0 / jnp.sqrt(jnp.float32(dh)))
    attn = jax.nn.softmax(scores, axis=-1)
    ctx = jnp.einsum("bhqk,bhkd->bhqd", attn.astype(jnp.bfloat16), v,
                     preferred_element_type=jnp.float32)
    ctx = ctx.transpose(0, 2, 1, 3).reshape(B * S, H).astype(jnp.bfloat16)

    attn_out = pallas_linear(ctx, p["wo"], p["bo"]).reshape(B, S, H)  # f32
    h = layer_norm(h + attn_out, p["ln1_g"], p["ln1_b"])

    # Fused linear + bias + GELU emitting bf16 -> fed straight into w2 matmul.
    ff = pallas_linear(h.reshape(B * S, H), p["w1"], p["b1"], gelu=True,
                       out_dtype=jnp.bfloat16)
    ff = pallas_linear(ff, p["w2"], p["b2"]).reshape(B, S, H)          # f32
    h = layer_norm(h + ff, p["ln2_g"], p["ln2_b"])
    return h


def bert_encoder(params, token_ids, num_heads):
    B, S = token_ids.shape
    emb = (
        params["word_emb"][token_ids]
        + params["pos_emb"][:S][None, :, :]
        + params["type_emb"][0][None, None, :]
    )
    h = layer_norm(emb, params["emb_ln_g"], params["emb_ln_b"])
    for layer_p in params["layers"]:
        h = transformer_layer(h, layer_p, num_heads)
    return h


def language_model_forward(params, x, y=None, *, num_heads, vocab_size=None):
    """Mirror of LanguageModel.forward: softmax probs (y=None) or mean CE loss."""
    B, S = x.shape
    H = params["word_emb"].shape[1]
    h = bert_encoder(params, x, num_heads)  # encoder(x)[0]
    # nn.Dropout(0.1) -> identity (eval).
    h2 = h.reshape(B * S, H)
    Vp = params["cls_w"].shape[1]
    if vocab_size is None:
        vocab_size = Vp
    if y is None:
        probs = pallas_classify_softmax(h2, params["cls_w"], params["cls_b"])
        return probs[:, :vocab_size].reshape(B, S, vocab_size)
    return pallas_classify_cross_entropy(
        h2, params["cls_w"], params["cls_b"], y.reshape(-1)
    )


# ----------------------------------------------------------------------------
# Deterministic parameter construction
# ----------------------------------------------------------------------------
def init_params(key, *, vocab, hidden, inter, num_layers, max_pos):
    def dense(k, fan_in, fan_out):
        return 0.02 * jax.random.normal(k, (fan_in, fan_out), jnp.float32)

    keys = iter(jax.random.split(key, 4 + num_layers * 4))

    # Classifier head: vocab padded to a multiple of 128 (lane-aligned tiles);
    # pad columns carry bias = -1e30 so they never perturb softmax / LSE.
    vp = _round_up(vocab, 128)
    cls_w = dense(next(keys), hidden, vocab)
    cls_b = jnp.zeros((vocab,), jnp.float32)
    if vp != vocab:
        cls_w = jnp.pad(cls_w, ((0, 0), (0, vp - vocab)))
        cls_b = jnp.pad(cls_b, ((0, vp - vocab),), constant_values=-1e30)

    params = {
        "word_emb": 0.02 * jax.random.normal(next(keys), (vocab, hidden), jnp.float32),
        "pos_emb": 0.02 * jax.random.normal(next(keys), (max_pos, hidden), jnp.float32),
        "type_emb": 0.02 * jax.random.normal(next(keys), (2, hidden), jnp.float32),
        "emb_ln_g": jnp.ones((hidden,), jnp.float32),
        "emb_ln_b": jnp.zeros((hidden,), jnp.float32),
        "cls_w": cls_w,
        "cls_b": cls_b,
        "layers": [],
    }
    for _ in range(num_layers):
        params["layers"].append(
            {
                # QKV pre-fused at init (no per-forward concat in the graph).
                "wqkv": dense(next(keys), hidden, 3 * hidden),
                "bqkv": jnp.zeros((3 * hidden,), jnp.float32),
                "wo": dense(next(keys), hidden, hidden),
                "bo": jnp.zeros((hidden,), jnp.float32),
                "w1": dense(next(keys), hidden, inter),
                "b1": jnp.zeros((inter,), jnp.float32),
                "w2": dense(next(keys), inter, hidden),
                "b2": jnp.zeros((hidden,), jnp.float32),
                "ln1_g": jnp.ones((hidden,), jnp.float32),
                "ln1_b": jnp.zeros((hidden,), jnp.float32),
                "ln2_g": jnp.ones((hidden,), jnp.float32),
                "ln2_b": jnp.zeros((hidden,), jnp.float32),
            }
        )
    return params


if __name__ == "__main__":
    VOCAB, HIDDEN, INTER = 128, 32, 128
    LAYERS, HEADS, MAX_POS = 2, 4, 64
    B, S = 2, 8

    root = jax.random.PRNGKey(0)
    k_par, k_tok, k_lab = jax.random.split(root, 3)
    params = init_params(
        k_par, vocab=VOCAB, hidden=HIDDEN, inter=INTER,
        num_layers=LAYERS, max_pos=MAX_POS
    )
    x = jax.random.randint(k_tok, (B, S), 0, VOCAB, dtype=jnp.int32)
    y = jax.random.randint(k_lab, (B, S), 0, VOCAB, dtype=jnp.int32)

    fwd = functools.partial(language_model_forward, num_heads=HEADS, vocab_size=VOCAB)
    fwd_probs = jax.jit(lambda p, t: fwd(p, t))
    fwd_loss = jax.jit(lambda p, t, lbl: fwd(p, t, lbl))

    # Inference branch: softmax probabilities over the vocab.
    probs = jax.block_until_ready(fwd_probs(params, x))
    assert probs.shape == (B, S, VOCAB)
    assert jnp.allclose(jnp.sum(probs, axis=-1), 1.0, atol=1e-3)

    # Training branch: mean cross-entropy loss (scalar).
    loss = jax.block_until_ready(fwd_loss(params, x, y))
    assert loss.shape == ()

    # Spot-check the fused Pallas head against a pure-JAX reference that uses
    # the same bf16 operand rounding (accumulation in f32 in both cases).
    h2 = jax.jit(lambda p, t: bert_encoder(p, t, HEADS))(params, x).reshape(
        B * S, HIDDEN
    )
    h_bf = h2.astype(jnp.bfloat16).astype(jnp.float32)
    w_bf = params["cls_w"].astype(jnp.bfloat16).astype(jnp.float32)
    ref_logits = h_bf @ w_bf + params["cls_b"]
    ref_probs = jax.nn.softmax(ref_logits, axis=-1)

    head_probs = pallas_classify_softmax(h2, params["cls_w"], params["cls_b"])
    # Tolerance covers the EUP approximate-reciprocal (+ Newton step) softmax.
    assert jnp.allclose(head_probs, ref_probs, rtol=1e-3, atol=1e-5), (
        "Pallas softmax head mismatch vs reference"
    )

    m = jnp.max(ref_logits, axis=-1, keepdims=True)
    lse = jnp.log(jnp.sum(jnp.exp(ref_logits - m), axis=-1, keepdims=True)) + m
    tgt = jnp.take_along_axis(ref_logits, y.reshape(-1, 1), axis=-1)
    ref_loss = jnp.mean(lse - tgt)
    assert jnp.allclose(loss, ref_loss, atol=1e-3), (loss, ref_loss)

    print("KERNEL_OK")
</pallas_src>

<mosaic_0001>
module attributes {stable_mosaic.version = 11 : i64} {
  func.func @_linear_kernel(%arg0: i32, %arg1: i32, %arg2: i32, %arg3: memref<16x32xbf16, #tpu.memory_space<vmem>>, %arg4: memref<32x96xbf16, #tpu.memory_space<vmem>>, %arg5: memref<1x96xf32, #tpu.memory_space<vmem>>, %arg6: memref<16x96xbf16, #tpu.memory_space<vmem>>, %arg7: memref<16x96xf32, #tpu.memory_space<vmem>>) attributes {dimension_semantics = [#tpu.dimension_semantics<parallel>, #tpu.dimension_semantics<parallel>, #tpu.dimension_semantics<arbitrary>], iteration_bounds = array<i64: 1, 1, 1>, scalar_prefetch = 0 : i64, scratch_operands = 1 : i64, tpu.core_type = #tpu.core_type<tc>, window_params = [{transform_indices = @transform_0, window_bounds = array<i64: 16, 32>}, {transform_indices = @transform_1, window_bounds = array<i64: 32, 96>}, {transform_indices = @transform_2, window_bounds = array<i64: 1, 96>}, {transform_indices = @transform_3, window_bounds = array<i64: 16, 96>}]} {
    %c0_i32 = arith.constant 0 : i32
    %0 = arith.cmpi eq, %arg2, %c0_i32 : i32
    %1 = arith.extui %0 : i1 to i32
    %c0_i32_0 = arith.constant 0 : i32
    %2 = arith.cmpi ne, %1, %c0_i32_0 : i32
    scf.if %2 {
      %cst_10 = arith.constant 0.000000e+00 : f32
      %12 = vector.broadcast %cst_10 : f32 to vector<16x96xf32>
      %c0_11 = arith.constant 0 : index
      %c0_12 = arith.constant 0 : index
      %13 = vector.load %arg7[%c0_11, %c0_12] : memref<16x96xf32, #tpu.memory_space<vmem>>, vector<16x96xf32>
      tpu.vector_store %arg7[%c0_11, %c0_12], %12 {strides = array<i32>} : memref<16x96xf32, #tpu.memory_space<vmem>>, vector<16x96xf32>,
    } else {
    }
    %c0 = arith.constant 0 : index
    %c0_1 = arith.constant 0 : index
    %3 = vector.load %arg7[%c0, %c0_1] : memref<16x96xf32, #tpu.memory_space<vmem>>, vector<16x96xf32>
    %c0_2 = arith.constant 0 : index
    %c0_3 = arith.constant 0 : index
    %4 = vector.load %arg3[%c0_2, %c0_3] : memref<16x32xbf16, #tpu.memory_space<vmem>>, vector<16x32xbf16>
    %c0_4 = arith.constant 0 : index
    %c0_5 = arith.constant 0 : index
    %5 = vector.load %arg4[%c0_4, %c0_5] : memref<32x96xbf16, #tpu.memory_space<vmem>>, vector<32x96xbf16>
    %cst = arith.constant dense<0.000000e+00> : vector<16x96xf32>
    %6 = tpu.matmul %4, %5, %cst {dimension_numbers = #tpu.dot_dimension_numbers<[1], [0], [0], [1], [0, 0, 1, 1], [], []>} : vector<16x32xbf16>, vector<32x96xbf16>, vector<16x96xf32> -> vector<16x96xf32>
    %7 = arith.addf %3, %6 : vector<16x96xf32>
    %c0_6 = arith.constant 0 : index
    %c0_7 = arith.constant 0 : index
    %8 = vector.load %arg7[%c0_6, %c0_7] : memref<16x96xf32, #tpu.memory_space<vmem>>, vector<16x96xf32>
    tpu.vector_store %arg7[%c0_6, %c0_7], %7 {strides = array<i32>} : memref<16x96xf32, #tpu.memory_space<vmem>>, vector<16x96xf32>,
    %c0_i32_8 = arith.constant 0 : i32
    %9 = arith.cmpi eq, %arg2, %c0_i32_8 : i32
    %10 = arith.extui %9 : i1 to i32
    %c0_i32_9 = arith.constant 0 : i32
    %11 = arith.cmpi ne, %10, %c0_i32_9 : i32
    scf.if %11 {
      %c0_10 = arith.constant 0 : index
      %c0_11 = arith.constant 0 : index
      %12 = vector.load %arg7[%c0_10, %c0_11] : memref<16x96xf32, #tpu.memory_space<vmem>>, vector<16x96xf32>
      %c0_12 = arith.constant 0 : index
      %c0_13 = arith.constant 0 : index
      %13 = vector.load %arg5[%c0_12, %c0_13] : memref<1x96xf32, #tpu.memory_space<vmem>>, vector<1x96xf32>
      %14 = vector.broadcast %13 : vector<1x96xf32> to vector<16x96xf32>
      %15 = arith.addf %12, %14 : vector<16x96xf32>
      %16 = arith.truncf %15 : vector<16x96xf32> to vector<16x96xbf16>
      %c0_14 = arith.constant 0 : index
      %c0_15 = arith.constant 0 : index
      %17 = vector.load %arg6[%c0_14, %c0_15] : memref<16x96xbf16, #tpu.memory_space<vmem>>, vector<16x96xbf16>
      tpu.vector_store %arg6[%c0_14, %c0_15], %16 {strides = array<i32>} : memref<16x96xbf16, #tpu.memory_space<vmem>>, vector<16x96xbf16>,
    } else {
    }
    return
  }
  func.func @transform_0(%arg0: i32, %arg1: i32, %arg2: i32) -> (i32, i32) {
    %c0_i32 = arith.constant 0 : i32
    return %arg1, %arg2 : i32, i32
  }
  func.func @transform_1(%arg0: i32, %arg1: i32, %arg2: i32) -> (i32, i32) {
    %c0_i32 = arith.constant 0 : i32
    return %arg2, %arg0 : i32, i32
  }
  func.func @transform_2(%arg0: i32, %arg1: i32, %arg2: i32) -> (i32, i32) {
    %c0_i32 = arith.constant 0 : i32
    %c0_i32_0 = arith.constant 0 : i32
    return %c0_i32, %arg0 : i32, i32
  }
  func.func @transform_3(%arg0: i32, %arg1: i32, %arg2: i32) -> (i32, i32) {
    %c0_i32 = arith.constant 0 : i32
    return %arg1, %arg0 : i32, i32
  }
}

module attributes {stable_mosaic.version = 11 : i64} {
  func.func @_linear_kernel(%arg0: i32, %arg1: i32, %arg2: i32, %arg3: memref<16x32xbf16, #tpu.memory_space<vmem>>, %arg4: memref<32x32xbf16, #tpu.memory_space<vmem>>, %arg5: memref<1x32xf32, #tpu.memory_space<vmem>>, %arg6: memref<16x32xf32, #tpu.memory_space<vmem>>, %arg7: memref<16x32xf32, #tpu.memory_space<vmem>>) attributes {dimension_semantics = [#tpu.dimension_semantics<parallel>, #tpu.dimension_semantics<parallel>, #tpu.dimension_semantics<arbitrary>], iteration_bounds = array<i64: 1, 1, 1>, scalar_prefetch = 0 : i64, scratch_operands = 1 : i64, tpu.core_type = #tpu.core_type<tc>, window_params = [{transform_indices = @transform_0, window_bounds = array<i64: 16, 32>}, {transform_indices = @transform_1, window_bounds = array<i64: 32, 32>}, {transform_indices = @transform_2, window_bounds = array<i64: 1, 32>}, {transform_indices = @transform_3, window_bounds = array<i64: 16, 32>}]} {
    %c0_i32 = arith.constant 0 : i32
    %0 = arith.cmpi eq, %arg2, %c0_i32 : i32
    %1 = arith.extui %0 : i1 to i32
    %c0_i32_0 = arith.constant 0 : i32
    %2 = arith.cmpi ne, %1, %c0_i32_0 : i32
    scf.if %2 {
      %cst_10 = arith.constant 0.000000e+00 : f32
      %12 = vector.broadcast %cst_10 : f32 to vector<16x32xf32>
      %c0_11 = arith.constant 0 : index
      %c0_12 = arith.constant 0 : index
      %13 = vector.load %arg7[%c0_11, %c0_12] : memref<16x32xf32, #tpu.memory_space<vmem>>, vector<16x32xf32>
      tpu.vector_store %arg7[%c0_11, %c0_12], %12 {strides = array<i32>} : memref<16x32xf32, #tpu.memory_space<vmem>>, vector<16x32xf32>,
    } else {
    }
    %c0 = arith.constant 0 : index
    %c0_1 = arith.constant 0 : index
    %3 = vector.load %arg7[%c0, %c0_1] : memref<16x32xf32, #tpu.memory_space<vmem>>, vector<16x32xf32>
    %c0_2 = arith.constant 0 : index
    %c0_3 = arith.constant 0 : index
    %4 = vector.load %arg3[%c0_2, %c0_3] : memref<16x32xbf16, #tpu.memory_space<vmem>>, vector<16x32xbf16>
    %c0_4 = arith.constant 0 : index
    %c0_5 = arith.constant 0 : index
    %5 = vector.load %arg4[%c0_4, %c0_5] : memref<32x32xbf16, #tpu.memory_space<vmem>>, vector<32x32xbf16>
    %cst = arith.constant dense<0.000000e+00> : vector<16x32xf32>
    %6 = tpu.matmul %4, %5, %cst {dimension_numbers = #tpu.dot_dimension_numbers<[1], [0], [0], [1], [0, 0, 1, 1], [], []>} : vector<16x32xbf16>, vector<32x32xbf16>, vector<16x32xf32> -> vector<16x32xf32>
    %7 = arith.addf %3, %6 : vector<16x32xf32>
    %c0_6 = arith.constant 0 : index
    %c0_7 = arith.constant 0 : index
    %8 = vector.load %arg7[%c0_6, %c0_7] : memref<16x32xf32, #tpu.memory_space<vmem>>, vector<16x32xf32>
    tpu.vector_store %arg7[%c0_6, %c0_7], %7 {strides = array<i32>} : memref<16x32xf32, #tpu.memory_space<vmem>>, vector<16x32xf32>,
    %c0_i32_8 = arith.constant 0 : i32
    %9 = arith.cmpi eq, %arg2, %c0_i32_8 : i32
    %10 = arith.extui %9 : i1 to i32
    %c0_i32_9 = arith.constant 0 : i32
    %11 = arith.cmpi ne, %10, %c0_i32_9 : i32
    scf.if %11 {
      %c0_10 = arith.constant 0 : index
      %c0_11 = arith.constant 0 : index
      %12 = vector.load %arg7[%c0_10, %c0_11] : memref<16x32xf32, #tpu.memory_space<vmem>>, vector<16x32xf32>
      %c0_12 = arith.constant 0 : index
      %c0_13 = arith.constant 0 : index
      %13 = vector.load %arg5[%c0_12, %c0_13] : memref<1x32xf32, #tpu.memory_space<vmem>>, vector<1x32xf32>
      %14 = vector.broadcast %13 : vector<1x32xf32> to vector<16x32xf32>
      %15 = arith.addf %12, %14 : vector<16x32xf32>
      %c0_14 = arith.constant 0 : index
      %c0_15 = arith.constant 0 : index
      %16 = vector.load %arg6[%c0_14, %c0_15] : memref<16x32xf32, #tpu.memory_space<vmem>>, vector<16x32xf32>
      tpu.vector_store %arg6[%c0_14, %c0_15], %15 {strides = array<i32>} : memref<16x32xf32, #tpu.memory_space<vmem>>, vector<16x32xf32>,
    } else {
    }
    return
  }
  func.func @transform_0(%arg0: i32, %arg1: i32, %arg2: i32) -> (i32, i32) {
    %c0_i32 = arith.constant 0 : i32
    return %arg1, %arg2 : i32, i32
  }
  func.func @transform_1(%arg0: i32, %arg1: i32, %arg2: i32) -> (i32, i32) {
    %c0_i32 = arith.constant 0 : i32
    return %arg2, %arg0 : i32, i32
  }
  func.func @transform_2(%arg0: i32, %arg1: i32, %arg2: i32) -> (i32, i32) {
    %c0_i32 = arith.constant 0 : i32
    %c0_i32_0 = arith.constant 0 : i32
    return %c0_i32, %arg0 : i32, i32
  }
  func.func @transform_3(%arg0: i32, %arg1: i32, %arg2: i32) -> (i32, i32) {
    %c0_i32 = arith.constant 0 : i32
    return %arg1, %arg0 : i32, i32
  }
}

module attributes {stable_mosaic.version = 11 : i64} {
  func.func @_linear_kernel(%arg0: i32, %arg1: i32, %arg2: i32, %arg3: memref<16x32xbf16, #tpu.memory_space<vmem>>, %arg4: memref<32x128xbf16, #tpu.memory_space<vmem>>, %arg5: memref<1x128xf32, #tpu.memory_space<vmem>>, %arg6: memref<16x128xbf16, #tpu.memory_space<vmem>>, %arg7: memref<16x128xf32, #tpu.memory_space<vmem>>) attributes {dimension_semantics = [#tpu.dimension_semantics<parallel>, #tpu.dimension_semantics<parallel>, #tpu.dimension_semantics<arbitrary>], iteration_bounds = array<i64: 1, 1, 1>, scalar_prefetch = 0 : i64, scratch_operands = 1 : i64, tpu.core_type = #tpu.core_type<tc>, window_params = [{transform_indices = @transform_0, window_bounds = array<i64: 16, 32>}, {transform_indices = @transform_1, window_bounds = array<i64: 32, 128>}, {transform_indices = @transform_2, window_bounds = array<i64: 1, 128>}, {transform_indices = @transform_3, window_bounds = array<i64: 16, 128>}]} {
    %c0_i32 = arith.constant 0 : i32
    %0 = arith.cmpi eq, %arg2, %c0_i32 : i32
    %1 = arith.extui %0 : i1 to i32
    %c0_i32_0 = arith.constant 0 : i32
    %2 = arith.cmpi ne, %1, %c0_i32_0 : i32
    scf.if %2 {
      %cst_10 = arith.constant 0.000000e+00 : f32
      %12 = vector.broadcast %cst_10 : f32 to vector<16x128xf32>
      %c0_11 = arith.constant 0 : index
      %c0_12 = arith.constant 0 : index
      %13 = vector.load %arg7[%c0_11, %c0_12] : memref<16x128xf32, #tpu.memory_space<vmem>>, vector<16x128xf32>
      tpu.vector_store %arg7[%c0_11, %c0_12], %12 {strides = array<i32>} : memref<16x128xf32, #tpu.memory_space<vmem>>, vector<16x128xf32>,
    } else {
    }
    %c0 = arith.constant 0 : index
    %c0_1 = arith.constant 0 : index
    %3 = vector.load %arg7[%c0, %c0_1] : memref<16x128xf32, #tpu.memory_space<vmem>>, vector<16x128xf32>
    %c0_2 = arith.constant 0 : index
    %c0_3 = arith.constant 0 : index
    %4 = vector.load %arg3[%c0_2, %c0_3] : memref<16x32xbf16, #tpu.memory_space<vmem>>, vector<16x32xbf16>
    %c0_4 = arith.constant 0 : index
    %c0_5 = arith.constant 0 : index
    %5 = vector.load %arg4[%c0_4, %c0_5] : memref<32x128xbf16, #tpu.memory_space<vmem>>, vector<32x128xbf16>
    %cst = arith.constant dense<0.000000e+00> : vector<16x128xf32>
    %6 = tpu.matmul %4, %5, %cst {dimension_numbers = #tpu.dot_dimension_numbers<[1], [0], [0], [1], [0, 0, 1, 1], [], []>} : vector<16x32xbf16>, vector<32x128xbf16>, vector<16x128xf32> -> vector<16x128xf32>
    %7 = arith.addf %3, %6 : vector<16x128xf32>
    %c0_6 = arith.constant 0 : index
    %c0_7 = arith.constant 0 : index
    %8 = vector.load %arg7[%c0_6, %c0_7] : memref<16x128xf32, #tpu.memory_space<vmem>>, vector<16x128xf32>
    tpu.vector_store %arg7[%c0_6, %c0_7], %7 {strides = array<i32>} : memref<16x128xf32, #tpu.memory_space<vmem>>, vector<16x128xf32>,
    %c0_i32_8 = arith.constant 0 : i32
    %9 = arith.cmpi eq, %arg2, %c0_i32_8 : i32
    %10 = arith.extui %9 : i1 to i32
    %c0_i32_9 = arith.constant 0 : i32
    %11 = arith.cmpi ne, %10, %c0_i32_9 : i32
    scf.if %11 {
      %c0_10 = arith.constant 0 : index
      %c0_11 = arith.constant 0 : index
      %12 = vector.load %arg7[%c0_10, %c0_11] : memref<16x128xf32, #tpu.memory_space<vmem>>, vector<16x128xf32>
      %c0_12 = arith.constant 0 : index
      %c0_13 = arith.constant 0 : index
      %13 = vector.load %arg5[%c0_12, %c0_13] : memref<1x128xf32, #tpu.memory_space<vmem>>, vector<1x128xf32>
      %14 = vector.broadcast %13 : vector<1x128xf32> to vector<16x128xf32>
      %15 = arith.addf %12, %14 : vector<16x128xf32>
      %16 = arith.mulf %15, %15 : vector<16x128xf32>
      %17 = arith.mulf %15, %16 : vector<16x128xf32>
      %cst_14 = arith.constant 4.471500e-02 : f32
      %18 = vector.broadcast %cst_14 : f32 to vector<16x128xf32>
      %19 = arith.mulf %18, %17 : vector<16x128xf32>
      %20 = arith.addf %15, %19 : vector<16x128xf32>
      %cst_15 = arith.constant 0.797884583 : f32
      %21 = vector.broadcast %cst_15 : f32 to vector<16x128xf32>
      %22 = arith.mulf %21, %20 : vector<16x128xf32>
      %23 = math.tanh %22 : vector<16x128xf32>
      %cst_16 = arith.constant 1.000000e+00 : f32
      %24 = vector.broadcast %cst_16 : f32 to vector<16x128xf32>
      %25 = arith.addf %24, %23 : vector<16x128xf32>
      %cst_17 = arith.constant 5.000000e-01 : f32
      %26 = vector.broadcast %cst_17 : f32 to vector<16x128xf32>
      %27 = arith.mulf %26, %25 : vector<16x128xf32>
      %28 = arith.mulf %15, %27 : vector<16x128xf32>
      %29 = arith.truncf %28 : vector<16x128xf32> to vector<16x128xbf16>
      %c0_18 = arith.constant 0 : index
      %c0_19 = arith.constant 0 : index
      %30 = vector.load %arg6[%c0_18, %c0_19] : memref<16x128xbf16, #tpu.memory_space<vmem>>, vector<16x128xbf16>
      tpu.vector_store %arg6[%c0_18, %c0_19], %29 {strides = array<i32>} : memref<16x128xbf16, #tpu.memory_space<vmem>>, vector<16x128xbf16>,
    } else {
    }
    return
  }
  func.func @transform_0(%arg0: i32, %arg1: i32, %arg2: i32) -> (i32, i32) {
    %c0_i32 = arith.constant 0 : i32
    return %arg1, %arg2 : i32, i32
  }
  func.func @transform_1(%arg0: i32, %arg1: i32, %arg2: i32) -> (i32, i32) {
    %c0_i32 = arith.constant 0 : i32
    return %arg2, %arg0 : i32, i32
  }
  func.func @transform_2(%arg0: i32, %arg1: i32, %arg2: i32) -> (i32, i32) {
    %c0_i32 = arith.constant 0 : i32
    %c0_i32_0 = arith.constant 0 : i32
    return %c0_i32, %arg0 : i32, i32
  }
  func.func @transform_3(%arg0: i32, %arg1: i32, %arg2: i32) -> (i32, i32) {
    %c0_i32 = arith.constant 0 : i32
    return %arg1, %arg0 : i32, i32
  }
}

module attributes {stable_mosaic.version = 11 : i64} {
  func.func @_linear_kernel(%arg0: i32, %arg1: i32, %arg2: i32, %arg3: memref<16x128xbf16, #tpu.memory_space<vmem>>, %arg4: memref<128x32xbf16, #tpu.memory_space<vmem>>, %arg5: memref<1x32xf32, #tpu.memory_space<vmem>>, %arg6: memref<16x32xf32, #tpu.memory_space<vmem>>, %arg7: memref<16x32xf32, #tpu.memory_space<vmem>>) attributes {dimension_semantics = [#tpu.dimension_semantics<parallel>, #tpu.dimension_semantics<parallel>, #tpu.dimension_semantics<arbitrary>], iteration_bounds = array<i64: 1, 1, 1>, scalar_prefetch = 0 : i64, scratch_operands = 1 : i64, tpu.core_type = #tpu.core_type<tc>, window_params = [{transform_indices = @transform_0, window_bounds = array<i64: 16, 128>}, {transform_indices = @transform_1, window_bounds = array<i64: 128, 32>}, {transform_indices = @transform_2, window_bounds = array<i64: 1, 32>}, {transform_indices = @transform_3, window_bounds = array<i64: 16, 32>}]} {
    %c0_i32 = arith.constant 0 : i32
    %0 = arith.cmpi eq, %arg2, %c0_i32 : i32
    %1 = arith.extui %0 : i1 to i32
    %c0_i32_0 = arith.constant 0 : i32
    %2 = arith.cmpi ne, %1, %c0_i32_0 : i32
    scf.if %2 {
      %cst_10 = arith.constant 0.000000e+00 : f32
      %12 = vector.broadcast %cst_10 : f32 to vector<16x32xf32>
      %c0_11 = arith.constant 0 : index
      %c0_12 = arith.constant 0 : index
      %13 = vector.load %arg7[%c0_11, %c0_12] : memref<16x32xf32, #tpu.memory_space<vmem>>, vector<16x32xf32>
      tpu.vector_store %arg7[%c0_11, %c0_12], %12 {strides = array<i32>} : memref<16x32xf32, #tpu.memory_space<vmem>>, vector<16x32xf32>,
    } else {
    }
    %c0 = arith.constant 0 : index
    %c0_1 = arith.constant 0 : index
    %3 = vector.load %arg7[%c0, %c0_1] : memref<16x32xf32, #tpu.memory_space<vmem>>, vector<16x32xf32>
    %c0_2 = arith.constant 0 : index
    %c0_3 = arith.constant 0 : index
    %4 = vector.load %arg3[%c0_2, %c0_3] : memref<16x128xbf16, #tpu.memory_space<vmem>>, vector<16x128xbf16>
    %c0_4 = arith.constant 0 : index
    %c0_5 = arith.constant 0 : index
    %5 = vector.load %arg4[%c0_4, %c0_5] : memref<128x32xbf16, #tpu.memory_space<vmem>>, vector<128x32xbf16>
    %cst = arith.constant dense<0.000000e+00> : vector<16x32xf32>
    %6 = tpu.matmul %4, %5, %cst {dimension_numbers = #tpu.dot_dimension_numbers<[1], [0], [0], [1], [0, 0, 1, 1], [], []>} : vector<16x128xbf16>, vector<128x32xbf16>, vector<16x32xf32> -> vector<16x32xf32>
    %7 = arith.addf %3, %6 : vector<16x32xf32>
    %c0_6 = arith.constant 0 : index
    %c0_7 = arith.constant 0 : index
    %8 = vector.load %arg7[%c0_6, %c0_7] : memref<16x32xf32, #tpu.memory_space<vmem>>, vector<16x32xf32>
    tpu.vector_store %arg7[%c0_6, %c0_7], %7 {strides = array<i32>} : memref<16x32xf32, #tpu.memory_space<vmem>>, vector<16x32xf32>,
    %c0_i32_8 = arith.constant 0 : i32
    %9 = arith.cmpi eq, %arg2, %c0_i32_8 : i32
    %10 = arith.extui %9 : i1 to i32
    %c0_i32_9 = arith.constant 0 : i32
    %11 = arith.cmpi ne, %10, %c0_i32_9 : i32
    scf.if %11 {
      %c0_10 = arith.constant 0 : index
      %c0_11 = arith.constant 0 : index
      %12 = vector.load %arg7[%c0_10, %c0_11] : memref<16x32xf32, #tpu.memory_space<vmem>>, vector<16x32xf32>
      %c0_12 = arith.constant 0 : index
      %c0_13 = arith.constant 0 : index
      %13 = vector.load %arg5[%c0_12, %c0_13] : memref<1x32xf32, #tpu.memory_space<vmem>>, vector<1x32xf32>
      %14 = vector.broadcast %13 : vector<1x32xf32> to vector<16x32xf32>
      %15 = arith.addf %12, %14 : vector<16x32xf32>
      %c0_14 = arith.constant 0 : index
      %c0_15 = arith.constant 0 : index
      %16 = vector.load %arg6[%c0_14, %c0_15] : memref<16x32xf32, #tpu.memory_space<vmem>>, vector<16x32xf32>
      tpu.vector_store %arg6[%c0_14, %c0_15], %15 {strides = array<i32>} : memref<16x32xf32, #tpu.memory_space<vmem>>, vector<16x32xf32>,
    } else {
    }
    return
  }
  func.func @transform_0(%arg0: i32, %arg1: i32, %arg2: i32) -> (i32, i32) {
    %c0_i32 = arith.constant 0 : i32
    return %arg1, %arg2 : i32, i32
  }
  func.func @transform_1(%arg0: i32, %arg1: i32, %arg2: i32) -> (i32, i32) {
    %c0_i32 = arith.constant 0 : i32
    return %arg2, %arg0 : i32, i32
  }
  func.func @transform_2(%arg0: i32, %arg1: i32, %arg2: i32) -> (i32, i32) {
    %c0_i32 = arith.constant 0 : i32
    %c0_i32_0 = arith.constant 0 : i32
    return %c0_i32, %arg0 : i32, i32
  }
  func.func @transform_3(%arg0: i32, %arg1: i32, %arg2: i32) -> (i32, i32) {
    %c0_i32 = arith.constant 0 : i32
    return %arg1, %arg0 : i32, i32
  }
}

module attributes {stable_mosaic.version = 11 : i64} {
  func.func @_classify_softmax_kernel(%arg0: i32, %arg1: memref<16x32xbf16, #tpu.memory_space<vmem>>, %arg2: memref<32x128xbf16, #tpu.memory_space<vmem>>, %arg3: memref<1x128xf32, #tpu.memory_space<vmem>>, %arg4: memref<16x128xf32, #tpu.memory_space<vmem>>) attributes {dimension_semantics = [#tpu.dimension_semantics<parallel>], iteration_bounds = array<i64: 1>, scalar_prefetch = 0 : i64, scratch_operands = 0 : i64, tpu.core_type = #tpu.core_type<tc>, window_params = [{transform_indices = @transform_0, window_bounds = array<i64: 16, 32>}, {pipeline_mode = #tpu.pipeline_mode<synchronous>, transform_indices = @transform_1, window_bounds = array<i64: 32, 128>}, {pipeline_mode = #tpu.pipeline_mode<synchronous>, transform_indices = @transform_2, window_bounds = array<i64: 1, 128>}, {transform_indices = @transform_3, window_bounds = array<i64: 16, 128>}]} {
    %c0 = arith.constant 0 : index
    %c0_0 = arith.constant 0 : index
    %0 = vector.load %arg1[%c0, %c0_0] : memref<16x32xbf16, #tpu.memory_space<vmem>>, vector<16x32xbf16>
    %c0_1 = arith.constant 0 : index
    %c0_2 = arith.constant 0 : index
    %1 = vector.load %arg2[%c0_1, %c0_2] : memref<32x128xbf16, #tpu.memory_space<vmem>>, vector<32x128xbf16>
    %cst = arith.constant dense<0.000000e+00> : vector<16x128xf32>
    %2 = tpu.matmul %0, %1, %cst {dimension_numbers = #tpu.dot_dimension_numbers<[1], [0], [0], [1], [0, 0, 1, 1], [], []>} : vector<16x32xbf16>, vector<32x128xbf16>, vector<16x128xf32> -> vector<16x128xf32>
    %c0_3 = arith.constant 0 : index
    %c0_4 = arith.constant 0 : index
    %3 = vector.load %arg3[%c0_3, %c0_4] : memref<1x128xf32, #tpu.memory_space<vmem>>, vector<1x128xf32>
    %4 = vector.broadcast %3 : vector<1x128xf32> to vector<16x128xf32>
    %5 = arith.addf %2, %4 : vector<16x128xf32>
    %cst_5 = arith.constant dense<0xFF800000> : vector<16xf32>
    %6 = vector.multi_reduction <maximumf>, %5, %cst_5 [1] : vector<16x128xf32> to vector<16xf32>
    %7 = vector.shape_cast %6 : vector<16xf32> to vector<16x1xf32>
    %8 = vector.broadcast %7 : vector<16x1xf32> to vector<16x128xf32>
    %9 = arith.subf %5, %8 : vector<16x128xf32>
    %10 = math.exp %9 : vector<16x128xf32>
    %cst_6 = arith.constant dense<0.000000e+00> : vector<16xf32>
    %11 = vector.multi_reduction <add>, %10, %cst_6 [1] : vector<16x128xf32> to vector<16xf32>
    %12 = vector.shape_cast %11 : vector<16xf32> to vector<16x1xf32>
    %13 = tpu.reciprocal %12 {approx = true} : vector<16x1xf32> -> vector<16x1xf32>
    %14 = arith.mulf %12, %13 : vector<16x1xf32>
    %cst_7 = arith.constant 2.000000e+00 : f32
    %15 = vector.broadcast %cst_7 : f32 to vector<16x1xf32>
    %16 = arith.subf %15, %14 : vector<16x1xf32>
    %17 = arith.mulf %13, %16 : vector<16x1xf32>
    %18 = vector.broadcast %17 : vector<16x1xf32> to vector<16x128xf32>
    %19 = arith.mulf %10, %18 : vector<16x128xf32>
    %c0_8 = arith.constant 0 : index
    %c0_9 = arith.constant 0 : index
    %20 = vector.load %arg4[%c0_8, %c0_9] : memref<16x128xf32, #tpu.memory_space<vmem>>, vector<16x128xf32>
    tpu.vector_store %arg4[%c0_8, %c0_9], %19 {strides = array<i32>} : memref<16x128xf32, #tpu.memory_space<vmem>>, vector<16x128xf32>,
    return
  }
  func.func @transform_0(%arg0: i32) -> (i32, i32) {
    %c0_i32 = arith.constant 0 : i32
    %c0_i32_0 = arith.constant 0 : i32
    return %arg0, %c0_i32 : i32, i32
  }
  func.func @transform_1(%arg0: i32) -> (i32, i32) {
    %c0_i32 = arith.constant 0 : i32
    %c0_i32_0 = arith.constant 0 : i32
    %c0_i32_1 = arith.constant 0 : i32
    return %c0_i32, %c0_i32_0 : i32, i32
  }
  func.func @transform_2(%arg0: i32) -> (i32, i32) {
    %c0_i32 = arith.constant 0 : i32
    %c0_i32_0 = arith.constant 0 : i32
    %c0_i32_1 = arith.constant 0 : i32
    return %c0_i32, %c0_i32_0 : i32, i32
  }
  func.func @transform_3(%arg0: i32) -> (i32, i32) {
    %c0_i32 = arith.constant 0 : i32
    %c0_i32_0 = arith.constant 0 : i32
    return %arg0, %c0_i32 : i32, i32
  }
}

</mosaic_0001>

<bundles_post_ra>
// kernel: _lambda_.10
= control target key start
LH: loop header
LB: loop body
LE: loop exit
PB: predicated region body
PF: predicated region fallthrough
CT: control target
= control target key end

     0   :  { %vm19_vm0 = vcmask 261120   ;;  %v137_v0 = vmov 0.0   ;;  %vm138_vm1 = vmmov 0   ;;  %s184_s1 = inlined_call_operand.vmem [shape: bf16[32,32], index: 1, kind: input, shape index: {}]   ;;  %s185_s0 = inlined_call_operand.vmem [shape: bf16[16,32], index: 0, kind: input, shape index: {}]   ;;  %s186_s2 = inlined_call_operand.vmem [shape: f32[1,32], index: 2, kind: input, shape index: {}]   ;;  %s187_s3 = inlined_call_operand.vmem [shape: f32[16,32], index: 3, kind: output, shape index: {}]  }
   0x1   :  { %124 = vmatprep.subr.bf16.mxu0 %v137_v0  ;;  %v134_v1 = vld [vmem:[%s184_s1 + $0x8] sm:$0xff]   ;;  %128 = vmatprep.mubr.msk.bf16.mxu0 %vm138_vm1, %v137_v0  ;;  %20 = vst.msk [vmem:[#allocation2] sm:$0xff] %vm19_vm0, %v137_v0  ;;  %21 = vst.msk [vmem:[#allocation2 + $0x8] sm:$0xff] %vm19_vm0, %v137_v0  ;;  %v135_v2 = vld [vmem:[%s184_s1] sm:$0xff]  }
   0x2   :  { %125 = vmatpush3.bf16.msra.mxu0 %v134_v1  ;;  %v136_v3 = vld [vmem:[%s185_s0] sm:$0xff]  }
   0x3   :  { %126 = vmatprep.subr.bf16.mxu0 %v137_v0  ;;  %v120_v12 = vld [vmem:[%s186_s2] ss:$0 sm:$0xff] }
   0x6   :  { %127 = vmatpush3.bf16.msra.mxu0 %v135_v2 }
   0x8   :  { %v22_v4 = vld [vmem:[#allocation2] sm:$0xff]  ;;  %v23_v8 = vld [vmem:[#allocation2 + $0x8] sm:$0xff] }
   0x9   :  { %129 = vmatmul.mubr.msk.bf16.vlgmr.msra.gmra.mxu0 %vm19_vm0, %v136_v3 }
  0xc9   :  { %v85_v5 = vpop.f32.mrf.mxu0 }
  0xca   :  { %v92_v6 = vadd.f32 %v85_v5, %v22_v4 }
  0xcb   :  { %v130_v7 = vpop.f32.mrf.mxu0 }
  0xcc   :  { %94 = vst.msk [vmem:[#allocation2] sm:$0xff] %vm19_vm0, %v92_v6 }
  0xcd   :  { %v88_v9 = vpop.f32.mrf.mxu0 }
  0xce   :  { %v93_v10 = vadd.f32 %v88_v9, %v23_v8 }
  0xcf   :  { %v131_v11 = vpop.f32.mrf.mxu0 }
  0xd0   :  { %95 = vst.msk [vmem:[#allocation2 + $0x8] sm:$0xff] %vm19_vm0, %v93_v10 }
  0xd3   :  { %v99_v13 = vld [vmem:[#allocation2] sm:$0xff] }
  0xd4   :  { %v108_v14 = vadd.f32 %v120_v12, %v99_v13 }
  0xd6   :  { %110 = vst.msk [vmem:[%s187_s3] sm:$0xff] %vm19_vm0, %v108_v14 }
  0xd7   :  { %v100_v15 = vld [vmem:[#allocation2 + $0x8] sm:$0xff] }
  0xd8   :  { %v109_v16 = vadd.f32 %v120_v12, %v100_v15 }
  0xda   :  { %111 = vst.msk [vmem:[%s187_s3 + $0x8] sm:$0xff] %vm19_vm0, %v109_v16 }

// kernel: _lambda_.9
= control target key start
LH: loop header
LB: loop body
LE: loop exit
PB: predicated region body
PF: predicated region fallthrough
CT: control target
= control target key end

     0   :  { %vm19_vm0 = vcmask 785408   ;;  %v151_v0 = vmov 0.0   ;;  %vm152_vm1 = vmmov 0   ;;  %vm47_vm2 = vcmask 261120   ;;  %s195_s1 = inlined_call_operand.vmem [shape: bf16[32,96], index: 1, kind: input, shape index: {}]   ;;  %s196_s0 = inlined_call_operand.vmem [shape: bf16[16,32], index: 0, kind: input, shape index: {}]   ;;  %s197_s2 = inlined_call_operand.vmem [shape: f32[1,96], index: 2, kind: input, shape index: {}]   ;;  %s198_s3 = inlined_call_operand.vmem [shape: bf16[16,96], index: 3, kind: output, shape index: {}]  }
   0x1   :  { %138 = vmatprep.subr.bf16.mxu0 %v151_v0  ;;  %v148_v1 = vld [vmem:[%s195_s1 + $0x8] sm:$0xff]   ;;  %142 = vmatprep.mubr.msk.bf16.mxu0 %vm152_vm1, %v151_v0  ;;  %20 = vst.msk [vmem:[#allocation2] sm:$0xff] %vm19_vm0, %v151_v0  ;;  %21 = vst.msk [vmem:[#allocation2 + $0x8] sm:$0xff] %vm19_vm0, %v151_v0  ;;  %v149_v2 = vld [vmem:[%s195_s1] sm:$0xff]   ;;  %vm119_vm3 = vcmask 781312  }
   0x2   :  { %139 = vmatpush3.bf16.msra.mxu0 %v148_v1  ;;  %v150_v3 = vld [vmem:[%s196_s0] sm:$0xff]  }
   0x3   :  { %140 = vmatprep.subr.bf16.mxu0 %v151_v0  ;;  %v130_v12 = vld [vmem:[%s197_s2] ss:$0 sm:$0xff] }
   0x6   :  { %141 = vmatpush3.bf16.msra.mxu0 %v149_v2 }
   0x8   :  { %v22_v4 = vld [vmem:[#allocation2] sm:$0xff]  ;;  %v23_v8 = vld [vmem:[#allocation2 + $0x8] sm:$0xff] }
   0x9   :  { %143 = vmatmul.mubr.msk.bf16.vlgmr.msra.gmra.mxu0 %vm47_vm2, %v150_v3 }
  0xc9   :  { %v85_v5 = vpop.f32.mrf.mxu0 }
  0xca   :  { %v92_v6 = vadd.f32 %v85_v5, %v22_v4 }
  0xcb   :  { %v144_v7 = vpop.f32.mrf.mxu0 }
  0xcc   :  { %95 = vst.msk [vmem:[#allocation2] sm:$0xff] %vm19_vm0, %v92_v6 }
  0xcd   :  { %v88_v9 = vpop.f32.mrf.mxu0 }
  0xce   :  { %v93_v10 = vadd.f32 %v88_v9, %v23_v8 }
  0xcf   :  { %v145_v11 = vpop.f32.mrf.mxu0 }
  0xd0   :  { %96 = vst.msk [vmem:[#allocation2 + $0x8] sm:$0xff] %vm19_vm0, %v93_v10 }
  0xd3   :  { %v100_v13 = vld [vmem:[#allocation2] sm:$0xff] }
  0xd4   :  { %v109_v14 = vadd.f32 %v130_v12, %v100_v13 }
  0xd6   :  { %v133_v15 = vpack.c.bf16 %v109_v14, %v109_v14 }
  0xd7   :  { %v101_v16 = vld [vmem:[#allocation2 + $0x8] sm:$0xff] }
  0xd8   :  { %120 = vst.msk [vmem:[%s198_s3] sm:$0xf] %vm119_vm3, %v133_v15  ;;  %v110_v17 = vadd.f32 %v130_v12, %v101_v16 }
  0xda   :  { %v134_v18 = vpack.c.bf16 %v110_v17, %v110_v17 }
  0xdc   :  { %121 = vst.msk [vmem:[%s198_s3 + $0x4] sm:$0xf] %vm119_vm3, %v134_v18 }

// kernel: _lambda_.11
= control target key start
LH: loop header
LB: loop body
LE: loop exit
PB: predicated region body
PF: predicated region fallthrough
CT: control target
= control target key end

     0   :  { %v175_v0 = vmov 0.0   ;;  %vm176_vm0 = vmmov 0   ;;  %vm46_vm1 = vcmask 261120   ;;  %s212_s1 = inlined_call_operand.vmem [shape: bf16[32,128], index: 1, kind: input, shape index: {}]   ;;  %s213_s0 = inlined_call_operand.vmem [shape: bf16[16,32], index: 0, kind: input, shape index: {}]   ;;  %s214_s2 = inlined_call_operand.vmem [shape: f32[1,128], index: 2, kind: input, shape index: {}]   ;;  %s215_s3 = inlined_call_operand.vmem [shape: bf16[16,128], index: 3, kind: output, shape index: {}]  }
   0x1   :  { %158 = vmatprep.subr.bf16.mxu0 %v175_v0  ;;  %v168_v1 = vld [vmem:[%s212_s1 + $0x8] sm:$0xff]   ;;  %162 = vmatprep.mubr.msk.bf16.mxu0 %vm176_vm0, %v175_v0  ;;  %v169_v2 = vld [vmem:[%s212_s1] sm:$0xff]  }
   0x2   :  { %159 = vmatpush3.bf16.msra.mxu0 %v168_v1  ;;  %v170_v3 = vld [vmem:[%s213_s0] sm:$0xff]  }
   0x3   :  { %160 = vmatprep.subr.bf16.mxu0 %v175_v0  ;;  %v145_v4 = vld [vmem:[%s214_s2] ss:$0 sm:$0xff] }
   0x6   :  { %161 = vmatpush3.bf16.msra.mxu0 %v169_v2 }
   0x9   :  { %163 = vmatmul.mubr.msk.bf16.vlgmr.msra.gmra.mxu0 %vm46_vm1, %v170_v3 }
  0xc9   :  { %v84_v5 = vpop.f32.mrf.mxu0 }
  0xca   :  { %v107_v6 = vadd.f32 %v145_v4, %v84_v5 }
  0xcb   :  { %v164_v7 = vpop.f32.mrf.mxu0 }
  0xcc   :  { %v109_v8 = vmul.f32 %v107_v6, %v107_v6 }
  0xcd   :  { %v87_v9 = vpop.f32.mrf.mxu0 }
  0xce   :  { %v111_v10 = vmul.f32 %v109_v8, %v107_v6  ;;  %v108_v11 = vadd.f32 %v145_v4, %v87_v9 }
  0xcf   :  { %v165_v12 = vpop.f32.mrf.mxu0 }
  0xd0   :  { %v113_v13 = vmul.f32 0.044715, %v111_v10  ;;  %v110_v14 = vmul.f32 %v108_v11, %v108_v11 }
  0xd2   :  { %v115_v15 = vadd.f32 %v113_v13, %v107_v6  ;;  %v112_v16 = vmul.f32 %v110_v14, %v108_v11 }
  0xd4   :  { %v117_v17 = vmul.f32 0.7978846, %v115_v15  ;;  %v114_v18 = vmul.f32 0.044715, %v112_v16 }
  0xd6   :  { %171 = vtanh.f32 %v117_v17  ;;  %v116_v19 = vadd.f32 %v114_v18, %v108_v11 }
  0xd8   :  { %v118_v20 = vmul.f32 0.7978846, %v116_v19 }
  0xda   :  { %173 = vtanh.f32 %v118_v20 }
  0xe3   :  { %v172_v21 = vpop.eup %171 }
  0xe4   :  { %v121_v22 = vadd.f32 1.0, %v172_v21 }
  0xe6   :  { %v123_v24 = vmul.f32 0.5, %v121_v22 }
  0xe7   :  { %v174_v23 = vpop.eup %173 }
  0xe8   :  { %v122_v25 = vadd.f32 1.0, %v174_v23  ;;  %v125_v27 = vmul.f32 %v123_v24, %v107_v6 }
  0xea   :  { %v124_v26 = vmul.f32 0.5, %v122_v25 }
  0xec   :  { %v126_v28 = vmul.f32 %v124_v26, %v108_v11 }
  0xee   :  { %v153_v29 = vpack.c.bf16 %v126_v28, %v125_v27 }
  0xf0   :  { %154 = vst [vmem:[%s215_s3] sm:$0xff] %v153_v29  }

// kernel: _lambda_.12
= control target key start
LH: loop header
LB: loop body
LE: loop exit
PB: predicated region body
PF: predicated region fallthrough
CT: control target
= control target key end

     0   :  { %vm19_vm0 = vcmask 261120   ;;  %v212_v0 = vmov 0.0   ;;  %vm213_vm1 = vmmov 0   ;;  %s276_s1 = inlined_call_operand.vmem [shape: bf16[128,32], index: 1, kind: input, shape index: {}]   ;;  %s277_s0 = inlined_call_operand.vmem [shape: bf16[16,128], index: 0, kind: input, shape index: {}]   ;;  %s278_s2 = inlined_call_operand.vmem [shape: f32[1,32], index: 2, kind: input, shape index: {}]   ;;  %s279_s3 = inlined_call_operand.vmem [shape: f32[16,32], index: 3, kind: output, shape index: {}]  }
   0x1   :  { %181 = vmatprep.subr.bf16.mxu0 %v212_v0  ;;  %v203_v1 = vld [vmem:[%s276_s1 + $0x38] sm:$0xff]   ;;  %197 = vmatprep.mubr.msk.bf16.mxu0 %vm213_vm1, %v212_v0  ;;  %20 = vst.msk [vmem:[#allocation2] sm:$0xff] %vm19_vm0, %v212_v0  ;;  %21 = vst.msk [vmem:[#allocation2 + $0x8] sm:$0xff] %vm19_vm0, %v212_v0  ;;  %v204_v2 = vld [vmem:[%s276_s1 + $0x30] sm:$0xff]  }
   0x2   :  { %182 = vmatpush3.bf16.msra.mxu0 %v203_v1  ;;  %v205_v3 = vld [vmem:[%s276_s1 + $0x28] sm:$0xff]   ;;  %v206_v4 = vld [vmem:[%s276_s1 + $0x20] sm:$0xff]   ;;  %v207_v5 = vld [vmem:[%s276_s1 + $0x18] sm:$0xff]  }
   0x3   :  { %183 = vmatprep.subr.bf16.mxu0 %v212_v0  ;;  %v208_v6 = vld [vmem:[%s276_s1 + $0x10] sm:$0xff]   ;;  %v209_v7 = vld [vmem:[%s276_s1 + $0x8] sm:$0xff]   ;;  %v210_v8 = vld [vmem:[%s276_s1] sm:$0xff]  }
   0x4   :  { %v211_v9 = vld [vmem:[%s277_s0] sm:$0xff]  }
   0x5   :  { %v171_v18 = vld [vmem:[%s278_s2] ss:$0 sm:$0xff] }
   0x6   :  { %184 = vmatpush3.bf16.msra.mxu0 %v204_v2 }
   0x7   :  { %185 = vmatprep.subr.bf16.mxu0 %v212_v0 }
   0x8   :  { %v22_v10 = vld [vmem:[#allocation2] sm:$0xff]  ;;  %v23_v14 = vld [vmem:[#allocation2 + $0x8] sm:$0xff] }
   0xa   :  { %186 = vmatpush3.bf16.msra.mxu0 %v205_v3 }
   0xb   :  { %187 = vmatprep.subr.bf16.mxu0 %v212_v0 }
   0xe   :  { %188 = vmatpush3.bf16.msra.mxu0 %v206_v4 }
   0xf   :  { %189 = vmatprep.subr.bf16.mxu0 %v212_v0 }
  0x12   :  { %190 = vmatpush3.bf16.msra.mxu0 %v207_v5 }
  0x13   :  { %191 = vmatprep.subr.bf16.mxu0 %v212_v0 }
  0x16   :  { %192 = vmatpush3.bf16.msra.mxu0 %v208_v6 }
  0x17   :  { %193 = vmatprep.subr.bf16.mxu0 %v212_v0 }
  0x1a   :  { %194 = vmatpush3.bf16.msra.mxu0 %v209_v7 }
  0x1b   :  { %195 = vmatprep.subr.bf16.mxu0 %v212_v0 }
  0x1e   :  { %196 = vmatpush3.bf16.msra.mxu0 %v210_v8 }
  0x21   :  { %198 = vmatmul.mubr.bf16.vlgmr.msra.gmra.mxu0 %v211_v9 }
  0xe1   :  { %v130_v11 = vpop.f32.mrf.mxu0 }
  0xe2   :  { %v137_v12 = vadd.f32 %v130_v11, %v22_v10 }
  0xe3   :  { %v199_v13 = vpop.f32.mrf.mxu0 }
  0xe4   :  { %140 = vst.msk [vmem:[#allocation2] sm:$0xff] %vm19_vm0, %v137_v12 }
  0xe5   :  { %v133_v15 = vpop.f32.mrf.mxu0 }
  0xe6   :  { %v138_v16 = vadd.f32 %v133_v15, %v23_v14 }
  0xe7   :  { %v200_v17 = vpop.f32.mrf.mxu0 }
  0xe8   :  { %141 = vst.msk [vmem:[#allocation2 + $0x8] sm:$0xff] %vm19_vm0, %v138_v16 }
  0xeb   :  { %v145_v19 = vld [vmem:[#allocation2] sm:$0xff] }
  0xec   :  { %v154_v20 = vadd.f32 %v171_v18, %v145_v19 }
  0xee   :  { %156 = vst.msk [vmem:[%s279_s3] sm:$0xff] %vm19_vm0, %v154_v20 }
  0xef   :  { %v146_v21 = vld [vmem:[#allocation2 + $0x8] sm:$0xff] }
  0xf0   :  { %v155_v22 = vadd.f32 %v171_v18, %v146_v21 }
  0xf2   :  { %157 = vst.msk [vmem:[%s279_s3 + $0x8] sm:$0xff] %vm19_vm0, %v155_v22 }

// kernel: _lambda_.17
= control target key start
LH: loop header
LB: loop body
LE: loop exit
PB: predicated region body
PF: predicated region fallthrough
CT: control target
= control target key end

     0   :  { %v187_v1 = vmov 0.0   ;;  %vm188_vm0 = vmmov 0   ;;  %s227_s0 = inlined_call_operand.vmem [shape: bf16[16,32], index: 0, kind: input, shape index: {}]   ;;  %s228_s1 = inlined_call_operand.vmem [shape: bf16[32,128], index: 1, kind: input, shape index: {}]   ;;  %s229_s2 = inlined_call_operand.vmem [shape: f32[1,128], index: 2, kind: input, shape index: {}]   ;;  %s230_s3 = inlined_call_operand.hbm [shape: f32[16,128], index: 3, kind: output, shape index: {}]  }
   0x1   :  { %v154_v0 = vld [vmem:[%s228_s1 + $0x8] sm:$0xff]   ;;  %141 = vmatprep.subr.bf16.mxu0 %v187_v1  ;;  %v155_v2 = vld [vmem:[%s228_s1] sm:$0xff]   ;;  %145 = vmatprep.mubr.msk.bf16.mxu0 %vm188_vm0, %v187_v1 }
   0x2   :  { %142 = vmatpush3.bf16.msra.mxu0 %v154_v0 }
   0x3   :  { %143 = vmatprep.subr.bf16.mxu0 %v187_v1 }
   0x4   :  { %8 = vsyncpa [#allocation3], 0  ;;  %v156_v3 = vld [vmem:[%s227_s0] sm:$0xff]   ;;  %vm46_vm1 = vcmask 261120   ;;  %s189_s0 = smov [#allocation2]  }
   0x5   :  { %v133_v4 = vld [vmem:[%s229_s2] ss:$0 sm:$0xff]  ;;  %s122_s1 = sshll.u32 %s189_s0, 4  ;;  %s123_s1 = int_to_ptr.vmem [resolvable:$true] %s122_s1 }
   0x6   :  { %144 = vmatpush3.bf16.msra.mxu0 %v155_v2  ;;  %s165_s2 = scalar_lea.vmem %s123_s1, 256  ;;  %p170_p1 = scmp.lt.s32.totalorder %s123_s1, %s123_s1 }
   0x7   :  { %p166_p0 = scmp.ne.s32.totalorder %s123_s1, %s165_s2  ;;  %p171_p2 = scmp.lt.s32.totalorder %s165_s2, %s165_s2 }
   0x9   :  { %146 = vmatmul.mubr.msk.bf16.vlgmr.msra.gmra.mxu0 %vm46_vm1, %v156_v3  ;;  %p172_p3 = por %p171_p2, %p170_p1 }
   0xb   :  { %p173_p4 = pnand %p172_p3, %p166_p0 }
  0xc9   :  { %v84_v5 = vpop.f32.mrf.mxu0 }
  0xca   :  { %v85_v6 = vadd.f32 %v133_v4, %v84_v5 }
  0xcb   :  { %v147_v7 = vpop.f32.mrf.mxu0 }
  0xcc   :  { %91 = vmax.xlane.f32.xlu0 %v85_v6 }
  0xcd   :  { %v87_v8 = vpop.f32.mrf.mxu0 }
  0xce   :  { %v88_v9 = vadd.f32 %v133_v4, %v87_v8 }
  0xcf   :  { %v148_v10 = vpop.f32.mrf.mxu0 }
  0xd0   :  { %93 = vmax.xlane.f32.xlu0 %v88_v9 }
 0x155   :  { %v92_v11 = vpop.xlane.xlu0 %91 }
 0x156   :  { %v95_v12 = vsub.f32 %v85_v6, %v92_v11 }
 0x158   :  { %v97_v13 = vmul.f32 1.442695, %v95_v12 }
 0x159   :  { %v94_v14 = vpop.xlane.xlu0 %93 }
 0x15a   :  { %157 = vpow2.f32 %v97_v13  ;;  %v96_v15 = vsub.f32 %v88_v9, %v94_v14 }
 0x15c   :  { %v99_v16 = vmul.f32 1.442695, %v96_v15 }
 0x15e   :  { %159 = vpow2.f32 %v99_v16 }
 0x167   :  { %v158_v17 = vpop.eup %157 }
 0x168   :  { %101 = vadd.xlane.f32.xlu1 %v158_v17 }
 0x16b   :  { %v160_v18 = vpop.eup %159 }
 0x16c   :  { %103 = vadd.xlane.f32.xlu1 %v160_v18 }
 0x1f1   :  { %v102_v19 = vpop.xlane.xlu1 %101 }
 0x1f2   :  { %161 = vrcp.f32 %v102_v19 }
 0x1f5   :  { %v104_v20 = vpop.xlane.xlu1 %103 }
 0x1f6   :  { %163 = vrcp.f32 %v104_v20 }
 0x1ff   :  { %v162_v21 = vpop.eup %161 }
 0x200   :  { %v107_v22 = vmul.f32 %v162_v21, %v102_v19 }
 0x202   :  { %v109_v23 = vsub.f32 2.0, %v107_v22 }
 0x203   :  { %v164_v24 = vpop.eup %163 }
 0x204   :  { %v111_v25 = vmul.f32 %v162_v21, %v109_v23  ;;  %v108_v26 = vmul.f32 %v164_v24, %v104_v20 }
 0x206   :  { %v113_v27 = vmul.f32 %v158_v17, %v111_v25  ;;  %v110_v28 = vsub.f32 2.0, %v108_v26 }
 0x208   :  { %115 = vst [vmem:[#allocation2] sm:$0xff] %v113_v27  ;;  %v112_v29 = vmul.f32 %v164_v24, %v110_v28 }
 0x20a   :  { %v114_v30 = vmul.f32 %v160_v18, %v112_v29 }
 0x20c   :  { %116 = vst [vmem:[#allocation2 + $0x8] sm:$0xff] %v114_v30 }
 0x20d   :  { %176 = shalt.err (!%p173_p4)
}
 0x20e   :  { %s190_s20 = smov 128   ;;  %s191_s21 = smov 8  }
 0x20f   :  { %128 = dma.vmem_to_hbm [thread:$0]  %s123_s1, 256, %s230_s3, [#allocation3], %s190_s20, %s190_s20, %s191_s21  }
 0x210   :  { %185 = dma.done.wait [#allocation3], 256  }
 0x211   :  { %186 = vsyncadd [#allocation3], 4294967040 }
 0x212   :  { %132 = vsyncpa [#allocation3], 1 }

</bundles_post_ra>
